<compile_context>
chip_gen: v7x
topology: tpu7x:2x2x1
jax: 0.10.0
libtpu: 0.0.40
codegen_flags: <defaults>
</compile_context>

<pallas_src>
import jax
import jax.numpy as jnp
from jax.experimental import pallas as pl
from jax.experimental.pallas import tpu as pltpu


def gated_mlp_kernel(x_ref, wu_ref, wg_ref, wd_ref, o_ref, acc_ref):
    k = pl.program_id(1)

    @pl.when(k == 0)
    def _init():
        acc_ref[...] = jnp.zeros_like(acc_ref)

    x = x_ref[...]                                                   # (tm, Dp)
    up = jnp.dot(x, wu_ref[...], preferred_element_type=jnp.float32)    # (tm, tk)
    gate = jnp.dot(x, wg_ref[...], preferred_element_type=jnp.float32)  # (tm, tk)
    # up * SiLU(gate)   (rotations already folded into the weights)
    gated = up * (gate * jax.nn.sigmoid(gate))
    acc_ref[...] += jnp.dot(gated.astype(wd_ref.dtype), wd_ref[...],
                            preferred_element_type=jnp.float32)

    @pl.when(k == pl.num_programs(1) - 1)
    def _finalize():
        o_ref[...] = acc_ref[...].astype(o_ref.dtype)


def _round_up(n, m):
    return (n + m - 1) // m * m


def _pad2d(a, rows, cols):
    r, c = a.shape
    if r == rows and c == cols:
        return a
    return jnp.pad(a, ((0, rows - r), (0, cols - c)))


def mlp_wrapper(x, w_up, w_gate, w_down,
                h_up=None, h_gate=None, h_down=None,
                *, tile_m=256, tile_k=512, weights_dtype=None,
                single_buffer_weights=True):
    """x: (S, dim).  w_up/w_gate: (hidden, dim), w_down: (dim, hidden)
    (PyTorch (out, in) layout).  h_*: optional (hidden, hidden) Hadamards.
    Returns (S, dim)."""
    S, dim = x.shape
    hidden = w_up.shape[0]

    # ---- fold the Hadamard rotations into the weights (host-side, once) ----
    w_up_eff = w_up if h_up is None else h_up @ w_up              # (hidden, dim)
    w_gate_eff = w_gate if h_gate is None else h_gate @ w_gate    # (hidden, dim)
    wd_t = w_down.T if h_down is None else h_down @ w_down.T      # (hidden, dim)
    wu_t = w_up_eff.T                                             # (dim, hidden)
    wg_t = w_gate_eff.T                                           # (dim, hidden)

    if weights_dtype is not None:       # e.g. jnp.bfloat16 on v6e / v7x
        wu_t = wu_t.astype(weights_dtype)
        wg_t = wg_t.astype(weights_dtype)
        wd_t = wd_t.astype(weights_dtype)

    # ---- pad to TPU-friendly shapes (lane = 128, sublane = 8) ----
    dim_p = _round_up(dim, 128)
    hid_p = _round_up(hidden, 128)
    tm = min(tile_m, _round_up(S, 8))
    tk = min(tile_k, hid_p)
    hid_p = _round_up(hid_p, tk)
    s_p = _round_up(S, tm)

    x_p = _pad2d(x, s_p, dim_p)
    wu_p = _pad2d(wu_t, dim_p, hid_p)
    wg_p = _pad2d(wg_t, dim_p, hid_p)
    wd_p = _pad2d(wd_t, hid_p, dim_p)

    grid = (s_p // tm, hid_p // tk)
    n_k = grid[1]

    # ---- VMEM budget: weights x buffer count + io tiles + accumulator ----
    w_item = jnp.dtype(wu_p.dtype).itemsize
    x_item = jnp.dtype(x.dtype).itemsize
    w_buf = 1 if (single_buffer_weights and n_k == 1) else 2
    working_set = (
        2 * tm * dim_p * x_item                            # x tile (double buffered)
        + w_buf * (2 * dim_p * tk + tk * dim_p) * w_item   # W_up^T, W_gate^T, W_down^T
        + 2 * tm * dim_p * x_item                          # out tile (double buffered)
        + tm * dim_p * 4                                   # f32 accumulator scratch
        + 3 * tm * tk * 4                                  # up / gate / gated live values
    )
    vmem_limit = int(min(max(int(working_set * 1.25), 32 * 1024 * 1024),
                         64 * 1024 * 1024))

    def build(use_single_buffer):
        w_kwargs = {}
        if use_single_buffer and n_k == 1:
            # Weight blocks are grid-invariant: no need to double-buffer them.
            w_kwargs = dict(pipeline_mode=pl.Buffered(1))
        in_specs = [
            pl.BlockSpec((tm, dim_p), lambda i, k: (i, 0)),               # x tile
            pl.BlockSpec((dim_p, tk), lambda i, k: (0, k), **w_kwargs),   # W_up^T
            pl.BlockSpec((dim_p, tk), lambda i, k: (0, k), **w_kwargs),   # W_gate^T
            pl.BlockSpec((tk, dim_p), lambda i, k: (k, 0), **w_kwargs),   # W_down^T
        ]
        return pl.pallas_call(
            gated_mlp_kernel,
            out_shape=jax.ShapeDtypeStruct((s_p, dim_p), x.dtype),
            grid_spec=pltpu.PrefetchScalarGridSpec(
                num_scalar_prefetch=0,
                grid=grid,
                in_specs=in_specs,
                out_specs=pl.BlockSpec((tm, dim_p), lambda i, k: (i, 0)),
                scratch_shapes=[pltpu.VMEM((tm, dim_p), jnp.float32)],
            ),
            compiler_params=pltpu.CompilerParams(
                dimension_semantics=("parallel", "arbitrary"),
                vmem_limit_bytes=vmem_limit,
            ),
        )

    try:
        out_p = build(single_buffer_weights)(x_p, wu_p, wg_p, wd_p)
        out_p = jax.block_until_ready(out_p)
    except Exception:
        # pl.Buffered(1) not supported on this jax/backend: fall back to the
        # default (double-buffered) weight specs.
        out_p = build(False)(x_p, wu_p, wg_p, wd_p)
        out_p = jax.block_until_ready(out_p)

    return out_p[:S, :dim]


def _hadamard(n, dtype=jnp.float32):
    """Normalized Sylvester Hadamard matrix (n power of 2), H @ H.T = I."""
    h = jnp.array([[1.0]], dtype=jnp.float32)
    while h.shape[0] < n:
        h = jnp.block([[h, h], [h, -h]])
    return (h / jnp.sqrt(jnp.float32(n))).astype(dtype)


def _reference(x, w_up, w_gate, w_down, h_up, h_gate, h_down):
    up = x @ w_up.T
    gate = x @ w_gate.T
    if h_up is not None:
        up = up @ h_up.T
    if h_gate is not None:
        gate = gate @ h_gate.T
    gated = up * (gate * jax.nn.sigmoid(gate))       # up * SiLU(gate)
    if h_down is not None:
        gated = gated @ h_down
    return gated @ w_down.T


if __name__ == "__main__":
    key = jax.random.PRNGKey(0)
    seq, dim, hidden = 16, 32, 64       # small; hidden a power of 2 for Hadamard

    k1, k2, k3, k4 = jax.random.split(key, 4)
    x = jax.random.normal(k1, (seq, dim), dtype=jnp.float32)
    w_up = jax.random.normal(k2, (hidden, dim), dtype=jnp.float32) * 0.05    # up_proj.weight (out,in)
    w_gate = jax.random.normal(k3, (hidden, dim), dtype=jnp.float32) * 0.05  # gate_proj.weight
    w_down = jax.random.normal(k4, (dim, hidden), dtype=jnp.float32) * 0.05  # down_proj.weight
    h_up = _hadamard(hidden)
    h_gate = _hadamard(hidden)
    h_down = _hadamard(hidden)

    out = mlp_wrapper(x, w_up, w_gate, w_down, h_up, h_gate, h_down)
    out = jax.block_until_ready(out)

    ref = _reference(x, w_up, w_gate, w_down, h_up, h_gate, h_down)
    assert out.shape == (seq, dim)
    assert jnp.allclose(out, ref, atol=1e-4, rtol=1e-4), "mismatch vs. reference"
    print("KERNEL_OK")
</pallas_src>

<mosaic_0001>
module attributes {stable_mosaic.version = 11 : i64} {
  func.func @gated_mlp_kernel(%arg0: i32, %arg1: i32, %arg2: memref<16x128xf32, #tpu.memory_space<vmem>>, %arg3: memref<128x128xf32, #tpu.memory_space<vmem>>, %arg4: memref<128x128xf32, #tpu.memory_space<vmem>>, %arg5: memref<128x128xf32, #tpu.memory_space<vmem>>, %arg6: memref<16x128xf32, #tpu.memory_space<vmem>>, %arg7: memref<16x128xf32, #tpu.memory_space<vmem>>) attributes {dimension_semantics = [#tpu.dimension_semantics<parallel>, #tpu.dimension_semantics<arbitrary>], iteration_bounds = array<i64: 1, 1>, scalar_prefetch = 0 : i64, scratch_operands = 1 : i64, tpu.core_type = #tpu.core_type<tc>, window_params = [{transform_indices = @transform_0, window_bounds = array<i64: 16, 128>}, {pipeline_mode = #tpu.pipeline_mode<synchronous>, transform_indices = @transform_1, window_bounds = array<i64: 128, 128>}, {pipeline_mode = #tpu.pipeline_mode<synchronous>, transform_indices = @transform_2, window_bounds = array<i64: 128, 128>}, {pipeline_mode = #tpu.pipeline_mode<synchronous>, transform_indices = @transform_3, window_bounds = array<i64: 128, 128>}, {transform_indices = @transform_4, window_bounds = array<i64: 16, 128>}]} {
    %c0_i32 = arith.constant 0 : i32
    %0 = arith.cmpi eq, %arg1, %c0_i32 : i32
    %1 = arith.extui %0 : i1 to i32
    %c0_i32_0 = arith.constant 0 : i32
    %2 = arith.cmpi ne, %1, %c0_i32_0 : i32
    scf.if %2 {
      %cst_17 = arith.constant 0.000000e+00 : f32
      %23 = vector.broadcast %cst_17 : f32 to vector<16x128xf32>
      %c0_18 = arith.constant 0 : index
      %c0_19 = arith.constant 0 : index
      %24 = vector.load %arg7[%c0_18, %c0_19] : memref<16x128xf32, #tpu.memory_space<vmem>>, vector<16x128xf32>
      tpu.vector_store %arg7[%c0_18, %c0_19], %23 {strides = array<i32>} : memref<16x128xf32, #tpu.memory_space<vmem>>, vector<16x128xf32>,
    } else {
    }
    %c0 = arith.constant 0 : index
    %c0_1 = arith.constant 0 : index
    %3 = vector.load %arg2[%c0, %c0_1] : memref<16x128xf32, #tpu.memory_space<vmem>>, vector<16x128xf32>
    %c0_2 = arith.constant 0 : index
    %c0_3 = arith.constant 0 : index
    %4 = vector.load %arg3[%c0_2, %c0_3] : memref<128x128xf32, #tpu.memory_space<vmem>>, vector<128x128xf32>
    %cst = arith.constant dense<0.000000e+00> : vector<16x128xf32>
    %5 = tpu.matmul %3, %4, %cst {dimension_numbers = #tpu.dot_dimension_numbers<[1], [0], [0], [1], [0, 0, 1, 1], [], []>} : vector<16x128xf32>, vector<128x128xf32>, vector<16x128xf32> -> vector<16x128xf32>
    %c0_4 = arith.constant 0 : index
    %c0_5 = arith.constant 0 : index
    %6 = vector.load %arg4[%c0_4, %c0_5] : memref<128x128xf32, #tpu.memory_space<vmem>>, vector<128x128xf32>
    %cst_6 = arith.constant dense<0.000000e+00> : vector<16x128xf32>
    %7 = tpu.matmul %3, %6, %cst_6 {dimension_numbers = #tpu.dot_dimension_numbers<[1], [0], [0], [1], [0, 0, 1, 1], [], []>} : vector<16x128xf32>, vector<128x128xf32>, vector<16x128xf32> -> vector<16x128xf32>
    %8 = arith.negf %7 : vector<16x128xf32>
    %9 = math.exp %8 : vector<16x128xf32>
    %cst_7 = arith.constant 1.000000e+00 : f32
    %10 = vector.broadcast %cst_7 : f32 to vector<16x128xf32>
    %11 = arith.addf %10, %9 : vector<16x128xf32>
    %12 = arith.divf %10, %11 : vector<16x128xf32>
    %13 = arith.mulf %7, %12 : vector<16x128xf32>
    %14 = arith.mulf %5, %13 : vector<16x128xf32>
    %c0_8 = arith.constant 0 : index
    %c0_9 = arith.constant 0 : index
    %15 = vector.load %arg7[%c0_8, %c0_9] : memref<16x128xf32, #tpu.memory_space<vmem>>, vector<16x128xf32>
    %c0_10 = arith.constant 0 : index
    %c0_11 = arith.constant 0 : index
    %16 = vector.load %arg5[%c0_10, %c0_11] : memref<128x128xf32, #tpu.memory_space<vmem>>, vector<128x128xf32>
    %cst_12 = arith.constant dense<0.000000e+00> : vector<16x128xf32>
    %17 = tpu.matmul %14, %16, %cst_12 {dimension_numbers = #tpu.dot_dimension_numbers<[1], [0], [0], [1], [0, 0, 1, 1], [], []>} : vector<16x128xf32>, vector<128x128xf32>, vector<16x128xf32> -> vector<16x128xf32>
    %18 = arith.addf %15, %17 : vector<16x128xf32>
    %c0_13 = arith.constant 0 : index
    %c0_14 = arith.constant 0 : index
    %19 = vector.load %arg7[%c0_13, %c0_14] : memref<16x128xf32, #tpu.memory_space<vmem>>, vector<16x128xf32>
    tpu.vector_store %arg7[%c0_13, %c0_14], %18 {strides = array<i32>} : memref<16x128xf32, #tpu.memory_space<vmem>>, vector<16x128xf32>,
    %c0_i32_15 = arith.constant 0 : i32
    %20 = arith.cmpi eq, %arg1, %c0_i32_15 : i32
    %21 = arith.extui %20 : i1 to i32
    %c0_i32_16 = arith.constant 0 : i32
    %22 = arith.cmpi ne, %21, %c0_i32_16 : i32
    scf.if %22 {
      %c0_17 = arith.constant 0 : index
      %c0_18 = arith.constant 0 : index
      %23 = vector.load %arg7[%c0_17, %c0_18] : memref<16x128xf32, #tpu.memory_space<vmem>>, vector<16x128xf32>
      %c0_19 = arith.constant 0 : index
      %c0_20 = arith.constant 0 : index
      %24 = vector.load %arg6[%c0_19, %c0_20] : memref<16x128xf32, #tpu.memory_space<vmem>>, vector<16x128xf32>
      tpu.vector_store %arg6[%c0_19, %c0_20], %23 {strides = array<i32>} : memref<16x128xf32, #tpu.memory_space<vmem>>, vector<16x128xf32>,
    } else {
    }
    return
  }
  func.func @transform_0(%arg0: i32, %arg1: i32) -> (i32, i32) {
    %c0_i32 = arith.constant 0 : i32
    %c0_i32_0 = arith.constant 0 : i32
    return %arg0, %c0_i32 : i32, i32
  }
  func.func @transform_1(%arg0: i32, %arg1: i32) -> (i32, i32) {
    %c0_i32 = arith.constant 0 : i32
    %c0_i32_0 = arith.constant 0 : i32
    return %c0_i32, %arg1 : i32, i32
  }
  func.func @transform_2(%arg0: i32, %arg1: i32) -> (i32, i32) {
    %c0_i32 = arith.constant 0 : i32
    %c0_i32_0 = arith.constant 0 : i32
    return %c0_i32, %arg1 : i32, i32
  }
  func.func @transform_3(%arg0: i32, %arg1: i32) -> (i32, i32) {
    %c0_i32 = arith.constant 0 : i32
    %c0_i32_0 = arith.constant 0 : i32
    return %arg1, %c0_i32 : i32, i32
  }
  func.func @transform_4(%arg0: i32, %arg1: i32) -> (i32, i32) {
    %c0_i32 = arith.constant 0 : i32
    %c0_i32_0 = arith.constant 0 : i32
    return %arg0, %c0_i32 : i32, i32
  }
}

module attributes {stable_mosaic.version = 11 : i64} {
  func.func @gated_mlp_kernel(%arg0: i32, %arg1: i32, %arg2: memref<16x128xf32, #tpu.memory_space<vmem>>, %arg3: memref<128x128xf32, #tpu.memory_space<vmem>>, %arg4: memref<128x128xf32, #tpu.memory_space<vmem>>, %arg5: memref<128x128xf32, #tpu.memory_space<vmem>>, %arg6: memref<16x128xf32, #tpu.memory_space<vmem>>, %arg7: memref<16x128xf32, #tpu.memory_space<vmem>>) attributes {dimension_semantics = [#tpu.dimension_semantics<parallel>, #tpu.dimension_semantics<arbitrary>], iteration_bounds = array<i64: 1, 1>, scalar_prefetch = 0 : i64, scratch_operands = 1 : i64, tpu.core_type = #tpu.core_type<tc>, window_params = [{transform_indices = @transform_0, window_bounds = array<i64: 16, 128>}, {transform_indices = @transform_1, window_bounds = array<i64: 128, 128>}, {transform_indices = @transform_2, window_bounds = array<i64: 128, 128>}, {transform_indices = @transform_3, window_bounds = array<i64: 128, 128>}, {transform_indices = @transform_4, window_bounds = array<i64: 16, 128>}]} {
    %c0_i32 = arith.constant 0 : i32
    %0 = arith.cmpi eq, %arg1, %c0_i32 : i32
    %1 = arith.extui %0 : i1 to i32
    %c0_i32_0 = arith.constant 0 : i32
    %2 = arith.cmpi ne, %1, %c0_i32_0 : i32
    scf.if %2 {
      %cst_17 = arith.constant 0.000000e+00 : f32
      %23 = vector.broadcast %cst_17 : f32 to vector<16x128xf32>
      %c0_18 = arith.constant 0 : index
      %c0_19 = arith.constant 0 : index
      %24 = vector.load %arg7[%c0_18, %c0_19] : memref<16x128xf32, #tpu.memory_space<vmem>>, vector<16x128xf32>
      tpu.vector_store %arg7[%c0_18, %c0_19], %23 {strides = array<i32>} : memref<16x128xf32, #tpu.memory_space<vmem>>, vector<16x128xf32>,
    } else {
    }
    %c0 = arith.constant 0 : index
    %c0_1 = arith.constant 0 : index
    %3 = vector.load %arg2[%c0, %c0_1] : memref<16x128xf32, #tpu.memory_space<vmem>>, vector<16x128xf32>
    %c0_2 = arith.constant 0 : index
    %c0_3 = arith.constant 0 : index
    %4 = vector.load %arg3[%c0_2, %c0_3] : memref<128x128xf32, #tpu.memory_space<vmem>>, vector<128x128xf32>
    %cst = arith.constant dense<0.000000e+00> : vector<16x128xf32>
    %5 = tpu.matmul %3, %4, %cst {dimension_numbers = #tpu.dot_dimension_numbers<[1], [0], [0], [1], [0, 0, 1, 1], [], []>} : vector<16x128xf32>, vector<128x128xf32>, vector<16x128xf32> -> vector<16x128xf32>
    %c0_4 = arith.constant 0 : index
    %c0_5 = arith.constant 0 : index
    %6 = vector.load %arg4[%c0_4, %c0_5] : memref<128x128xf32, #tpu.memory_space<vmem>>, vector<128x128xf32>
    %cst_6 = arith.constant dense<0.000000e+00> : vector<16x128xf32>
    %7 = tpu.matmul %3, %6, %cst_6 {dimension_numbers = #tpu.dot_dimension_numbers<[1], [0], [0], [1], [0, 0, 1, 1], [], []>} : vector<16x128xf32>, vector<128x128xf32>, vector<16x128xf32> -> vector<16x128xf32>
    %8 = arith.negf %7 : vector<16x128xf32>
    %9 = math.exp %8 : vector<16x128xf32>
    %cst_7 = arith.constant 1.000000e+00 : f32
    %10 = vector.broadcast %cst_7 : f32 to vector<16x128xf32>
    %11 = arith.addf %10, %9 : vector<16x128xf32>
    %12 = arith.divf %10, %11 : vector<16x128xf32>
    %13 = arith.mulf %7, %12 : vector<16x128xf32>
    %14 = arith.mulf %5, %13 : vector<16x128xf32>
    %c0_8 = arith.constant 0 : index
    %c0_9 = arith.constant 0 : index
    %15 = vector.load %arg7[%c0_8, %c0_9] : memref<16x128xf32, #tpu.memory_space<vmem>>, vector<16x128xf32>
    %c0_10 = arith.constant 0 : index
    %c0_11 = arith.constant 0 : index
    %16 = vector.load %arg5[%c0_10, %c0_11] : memref<128x128xf32, #tpu.memory_space<vmem>>, vector<128x128xf32>
    %cst_12 = arith.constant dense<0.000000e+00> : vector<16x128xf32>
    %17 = tpu.matmul %14, %16, %cst_12 {dimension_numbers = #tpu.dot_dimension_numbers<[1], [0], [0], [1], [0, 0, 1, 1], [], []>} : vector<16x128xf32>, vector<128x128xf32>, vector<16x128xf32> -> vector<16x128xf32>
    %18 = arith.addf %15, %17 : vector<16x128xf32>
    %c0_13 = arith.constant 0 : index
    %c0_14 = arith.constant 0 : index
    %19 = vector.load %arg7[%c0_13, %c0_14] : memref<16x128xf32, #tpu.memory_space<vmem>>, vector<16x128xf32>
    tpu.vector_store %arg7[%c0_13, %c0_14], %18 {strides = array<i32>} : memref<16x128xf32, #tpu.memory_space<vmem>>, vector<16x128xf32>,
    %c0_i32_15 = arith.constant 0 : i32
    %20 = arith.cmpi eq, %arg1, %c0_i32_15 : i32
    %21 = arith.extui %20 : i1 to i32
    %c0_i32_16 = arith.constant 0 : i32
    %22 = arith.cmpi ne, %21, %c0_i32_16 : i32
    scf.if %22 {
      %c0_17 = arith.constant 0 : index
      %c0_18 = arith.constant 0 : index
      %23 = vector.load %arg7[%c0_17, %c0_18] : memref<16x128xf32, #tpu.memory_space<vmem>>, vector<16x128xf32>
      %c0_19 = arith.constant 0 : index
      %c0_20 = arith.constant 0 : index
      %24 = vector.load %arg6[%c0_19, %c0_20] : memref<16x128xf32, #tpu.memory_space<vmem>>, vector<16x128xf32>
      tpu.vector_store %arg6[%c0_19, %c0_20], %23 {strides = array<i32>} : memref<16x128xf32, #tpu.memory_space<vmem>>, vector<16x128xf32>,
    } else {
    }
    return
  }
  func.func @transform_0(%arg0: i32, %arg1: i32) -> (i32, i32) {
    %c0_i32 = arith.constant 0 : i32
    %c0_i32_0 = arith.constant 0 : i32
    return %arg0, %c0_i32 : i32, i32
  }
  func.func @transform_1(%arg0: i32, %arg1: i32) -> (i32, i32) {
    %c0_i32 = arith.constant 0 : i32
    %c0_i32_0 = arith.constant 0 : i32
    return %c0_i32, %arg1 : i32, i32
  }
  func.func @transform_2(%arg0: i32, %arg1: i32) -> (i32, i32) {
    %c0_i32 = arith.constant 0 : i32
    %c0_i32_0 = arith.constant 0 : i32
    return %c0_i32, %arg1 : i32, i32
  }
  func.func @transform_3(%arg0: i32, %arg1: i32) -> (i32, i32) {
    %c0_i32 = arith.constant 0 : i32
    %c0_i32_0 = arith.constant 0 : i32
    return %arg1, %c0_i32 : i32, i32
  }
  func.func @transform_4(%arg0: i32, %arg1: i32) -> (i32, i32) {
    %c0_i32 = arith.constant 0 : i32
    %c0_i32_0 = arith.constant 0 : i32
    return %arg0, %c0_i32 : i32, i32
  }
}

</mosaic_0001>

<bundles_post_ra>
// kernel: tpu_custom_call.1
= control target key start
LH: loop header
LB: loop body
LE: loop exit
PB: predicated region body
PF: predicated region fallthrough
CT: control target
= control target key end

     0   :  { %9 = vsyncpa [#allocation4], 0  ;;  %s913_s0 = inlined_call_operand.hbm [shape: f32[16,128], index: 0, kind: input, shape index: {}]   ;;  %s914_s1 = inlined_call_operand.hbm [shape: f32[128,128], index: 1, kind: input, shape index: {}]   ;;  %s915_s2 = inlined_call_operand.hbm [shape: f32[128,128], index: 2, kind: input, shape index: {}]   ;;  %s916_s3 = inlined_call_operand.hbm [shape: f32[128,128], index: 3, kind: input, shape index: {}]   ;;  %s917_s4 = inlined_call_operand.hbm [shape: f32[16,128], index: 4, kind: output, shape index: {}]  }
   0x1   :  { %10 = vsyncpa [#allocation7], 0 }
   0x2   :  { %11 = vsyncpa [#allocation10], 0 }
   0x3   :  { %12 = vsyncpa [#allocation5], 0  ;;  %s792_s15 = smov [#allocation6]   ;;  %s793_s17 = smov [#allocation3]  }
   0x4   :  { %s30_s16 = sshll.u32 %s792_s15, 4  ;;  %s18_s18 = sshll.u32 %s793_s17, 4  ;;  %s31_s16 = int_to_ptr.vmem [resolvable:$true] %s30_s16  ;;  %s824_s18 = int_to_ptr.vmem [resolvable:$true] %s18_s18 }
   0x5   :  { %s674_s21 = scalar_lea.hbm %s914_s1, 2048 }
   0x6   :  { %p675_p0 = scmp.ne.s32.totalorder %s914_s1, %s674_s21  ;;  %p678_p1 = scmp.lt.u32.totalorder %s674_s21, %s914_s1 }
   0x8   :  { %p680_p2 = pnand %p678_p1, %p675_p0 }
   0xa   :  { %683 = shalt.err (!%p680_p2)
}
   0xb   :  { %s684_s26 = scalar_lea.vmem %s31_s16, 2048  ;;  %p689_p4 = scmp.lt.s32.totalorder %s31_s16, %s31_s16 }
   0xc   :  { %p685_p3 = scmp.ne.s32.totalorder %s31_s16, %s684_s26  ;;  %p690_p5 = scmp.lt.s32.totalorder %s684_s26, %s684_s26 }
   0xe   :  { %p691_p6 = por %p690_p5, %p689_p4 }
  0x10   :  { %p692_p7 = pnand %p691_p6, %p685_p3 }
  0x12   :  { %695 = shalt.err (!%p692_p7)
}
  0x13   :  { %s794_s27 = smov 128   ;;  %s795_s28 = smov 8  }
  0x14   :  { %36 = dma.hbm_to_vmem [thread:$0]  %s914_s1, 2048, %s31_s16, [#allocation7], %s794_s27, %s794_s27, %s795_s28  }
  0x15   :  { %s696_s7 = scalar_lea.hbm %s913_s0, 256 }
  0x16   :  { %p697_p8 = scmp.ne.s32.totalorder %s913_s0, %s696_s7  ;;  %p700_p9 = scmp.lt.u32.totalorder %s696_s7, %s913_s0 }
  0x18   :  { %p702_p10 = pnand %p700_p9, %p697_p8 }
  0x1a   :  { %705 = shalt.err (!%p702_p10)
}
  0x1b   :  { %s706_s12 = scalar_lea.vmem %s824_s18, 256  ;;  %p711_p12 = scmp.lt.s32.totalorder %s824_s18, %s824_s18 }
  0x1c   :  { %p707_p11 = scmp.ne.s32.totalorder %s824_s18, %s706_s12  ;;  %p712_p13 = scmp.lt.s32.totalorder %s706_s12, %s706_s12 }
  0x1e   :  { %p713_p0 = por %p712_p13, %p711_p12 }
  0x20   :  { %p714_p1 = pnand %p713_p0, %p707_p11 }
  0x22   :  { %717 = shalt.err (!%p714_p1)
}
  0x23   :  { %24 = dma.hbm_to_vmem [thread:$0]  %s913_s0, 256, %s824_s18, [#allocation4], %s794_s27, %s794_s27, %s795_s28  }
  0x24   :  { %s796_s14 = smov [#allocation8]   ;;  %s797_s16 = smov [#allocation9]  }
  0x25   :  { %s42_s15 = sshll.u32 %s796_s14, 4  ;;  %s54_s17 = sshll.u32 %s797_s16, 4  ;;  %s43_s15 = int_to_ptr.vmem [resolvable:$true] %s42_s15  ;;  %s861_s17 = int_to_ptr.vmem [resolvable:$true] %s54_s17 }
  0x26   :  { %s718_s21 = scalar_lea.hbm %s915_s2, 2048 }
  0x27   :  { %p719_p2 = scmp.ne.s32.totalorder %s915_s2, %s718_s21  ;;  %p722_p3 = scmp.lt.u32.totalorder %s718_s21, %s915_s2 }
  0x29   :  { %p724_p4 = pnand %p722_p3, %p719_p2 }
  0x2b   :  { %727 = shalt.err (!%p724_p4)
}
  0x2c   :  { %s728_s0 = scalar_lea.vmem %s43_s15, 2048  ;;  %p733_p6 = scmp.lt.s32.totalorder %s43_s15, %s43_s15 }
  0x2d   :  { %p729_p5 = scmp.ne.s32.totalorder %s43_s15, %s728_s0  ;;  %p734_p7 = scmp.lt.s32.totalorder %s728_s0, %s728_s0 }
  0x2f   :  { %p735_p8 = por %p734_p7, %p733_p6 }
  0x31   :  { %p736_p9 = pnand %p735_p8, %p729_p5 }
  0x33   :  { %739 = shalt.err (!%p736_p9)
}
  0x34   :  { %48 = dma.hbm_to_vmem [thread:$0]  %s915_s2, 2048, %s43_s15, [#allocation7], %s794_s27, %s794_s27, %s795_s28  }
  0x35   :  { %s740_s5 = scalar_lea.hbm %s916_s3, 2048 }
  0x36   :  { %p741_p10 = scmp.ne.s32.totalorder %s916_s3, %s740_s5  ;;  %p744_p11 = scmp.lt.u32.totalorder %s740_s5, %s916_s3 }
  0x38   :  { %p746_p12 = pnand %p744_p11, %p741_p10 }
  0x3a   :  { %749 = shalt.err (!%p746_p12)
}
  0x3b   :  { %s750_s10 = scalar_lea.vmem %s861_s17, 2048  ;;  %p755_p0 = scmp.lt.s32.totalorder %s861_s17, %s861_s17 }
  0x3c   :  { %p751_p13 = scmp.ne.s32.totalorder %s861_s17, %s750_s10  ;;  %p756_p1 = scmp.lt.s32.totalorder %s750_s10, %s750_s10 }
  0x3e   :  { %p757_p2 = por %p756_p1, %p755_p0 }
  0x40   :  { %p758_p3 = pnand %p757_p2, %p751_p13 }
  0x42   :  { %761 = shalt.err (!%p758_p3)
}
  0x43   :  { %60 = dma.hbm_to_vmem [thread:$0]  %s916_s3, 2048, %s861_s17, [#allocation10], %s794_s27, %s794_s27, %s795_s28  }
  0x44   :  { %784 = dma.done.wait [#allocation4], 256  }
  0x45   :  { %785 = vsyncadd [#allocation4], 4294967040 }
  0x46   :  { %786 = dma.done.wait [#allocation7], 4096  }
  0x47   :  { %787 = vsyncadd [#allocation7], 4294963200 }
  0x48   :  { %788 = dma.done.wait [#allocation10], 2048  }
  0x49   :  { %789 = vsyncadd [#allocation10], 4294965248  ;;  %v172_v0 = vld [vmem:[#allocation8] sm:$0xff]  ;;  %v173_v1 = vld [vmem:[#allocation8 + $0x8] sm:$0xff]  ;;  %s798_s3 = smov [#allocation11]  }
  0x4a   :  { %v174_v2 = vld [vmem:[#allocation8 + $0x10] sm:$0xff]  ;;  %v595_v3 = vpack.c.bf16 %v173_v1, %v172_v0  ;;  %v175_v4 = vld [vmem:[#allocation8 + $0x18] sm:$0xff]  ;;  %v176_v6 = vld [vmem:[#allocation8 + $0x20] sm:$0xff]  ;;  %s388_s12 = sshll.u32 %s798_s3, 4  ;;  %s389_s12 = int_to_ptr.vmem [resolvable:$true] %s388_s12 }
  0x4b   :  { %v599_v5 = vpack.c.bf16 %v175_v4, %v174_v2  ;;  %v177_v7 = vld [vmem:[#allocation8 + $0x28] sm:$0xff]  ;;  %v81_v8 = vld [vmem:[#allocation6] sm:$0xff]  ;;  %v178_v10 = vld [vmem:[#allocation8 + $0x30] sm:$0xff]  ;;  %s762_s1 = scalar_lea.vmem %s389_s12, 256  ;;  %p767_p5 = scmp.lt.s32.totalorder %s389_s12, %s389_s12 }
  0x4c   :  { %596 = vmatprep.subr.bf16.mxu1 %v595_v3  ;;  %v603_v9 = vpack.c.bf16 %v177_v7, %v176_v6  ;;  %v179_v11 = vld [vmem:[#allocation8 + $0x38] sm:$0xff]  ;;  %v82_v12 = vld [vmem:[#allocation6 + $0x8] sm:$0xff]  ;;  %v83_v14 = vld [vmem:[#allocation6 + $0x10] sm:$0xff]  ;;  %p763_p4 = scmp.ne.s32.totalorder %s389_s12, %s762_s1  ;;  %p768_p6 = scmp.lt.s32.totalorder %s762_s1, %s762_s1 }
  0x4d   :  { %598 = vmatpush3.bf16.msra.mxu1 %v595_v3  ;;  %v563_v13 = vpack.c.bf16 %v82_v12, %v81_v8  ;;  %v84_v15 = vld [vmem:[#allocation6 + $0x18] sm:$0xff]  ;;  %v79_v16 = vld [vmem:[#allocation3] sm:$0xff]  ;;  %v85_v18 = vld [vmem:[#allocation6 + $0x20] sm:$0xff]  ;;  %v607_v20 = vpack.c.bf16 %v179_v11, %v178_v10 }
  0x4e   :  { %600 = vmatprep.subr.bf16.mxu1 %v599_v5  ;;  %v567_v17 = vpack.c.bf16 %v84_v15, %v83_v14  ;;  %525 = vmatprep.mubr.f32.mxu1 %v79_v16  ;;  %v86_v19 = vld [vmem:[#allocation6 + $0x28] sm:$0xff]  ;;  %v180_v21 = vld [vmem:[#allocation8 + $0x40] sm:$0xff]  ;;  %v87_v24 = vld [vmem:[#allocation6 + $0x30] sm:$0xff]  ;;  %p769_p7 = por %p768_p6, %p767_p5 }
  0x4f   :  { %490 = vmatprep.mubr.f32.mxu0 %v79_v16  ;;  %564 = vmatprep.subr.bf16.mxu0 %v563_v13  ;;  %v181_v22 = vld [vmem:[#allocation8 + $0x48] sm:$0xff]  ;;  %v571_v23 = vpack.c.bf16 %v86_v19, %v85_v18  ;;  %v88_v25 = vld [vmem:[#allocation6 + $0x38] sm:$0xff]  ;;  %v182_v27 = vld [vmem:[#allocation8 + $0x50] sm:$0xff] }
  0x50   :  { %566 = vmatpush3.bf16.msra.mxu0 %v563_v13  ;;  %v611_v26 = vpack.c.bf16 %v181_v22, %v180_v21  ;;  %v183_v28 = vld [vmem:[#allocation8 + $0x58] sm:$0xff]  ;;  %v575_v29 = vpack.c.bf16 %v88_v25, %v87_v24  ;;  %v89_v30 = vld [vmem:[#allocation6 + $0x40] sm:$0xff]  ;;  %v90_v31 = vld [vmem:[#allocation6 + $0x48] sm:$0xff]  ;;  %p770_p8 = pnand %p769_p7, %p763_p4 }
  0x51   :  { %602 = vmatpush3.bf16.msra.mxu1 %v599_v5  ;;  %568 = vmatprep.subr.bf16.mxu0 %v567_v17  ;;  %v615_v32 = vpack.c.bf16 %v183_v28, %v182_v27  ;;  %v184_v33 = vld [vmem:[#allocation8 + $0x60] sm:$0xff]  ;;  %v185_v34 = vld [vmem:[#allocation8 + $0x68] sm:$0xff]  ;;  %v579_v35 = vpack.c.bf16 %v90_v31, %v89_v30  ;;  %v91_v36 = vld [vmem:[#allocation6 + $0x50] sm:$0xff] }
  0x52   :  { %604 = vmatprep.subr.bf16.mxu1 %v603_v9  ;;  %v92_v37 = vld [vmem:[#allocation6 + $0x58] sm:$0xff]  ;;  %v619_v38 = vpack.c.bf16 %v185_v34, %v184_v33  ;;  %v186_v39 = vld [vmem:[#allocation8 + $0x70] sm:$0xff]  ;;  %v93_v42 = vld [vmem:[#allocation6 + $0x60] sm:$0xff] }
  0x53   :  { %v187_v40 = vld [vmem:[#allocation8 + $0x78] sm:$0xff]  ;;  %v583_v41 = vpack.c.bf16 %v92_v37, %v91_v36  ;;  %v94_v43 = vld [vmem:[#allocation6 + $0x68] sm:$0xff]  ;;  %v95_v46 = vld [vmem:[#allocation6 + $0x70] sm:$0xff] }
  0x54   :  { %570 = vmatpush3.bf16.msra.mxu0 %v567_v17  ;;  %v623_v44 = vpack.c.bf16 %v187_v40, %v186_v39  ;;  %v587_v45 = vpack.c.bf16 %v94_v43, %v93_v42  ;;  %v96_v47 = vld [vmem:[#allocation6 + $0x78] sm:$0xff]  ;;  %v281_v50 = vld [vmem:[#allocation9] sm:$0xff]  ;;  %v282_v51 = vld [vmem:[#allocation9 + $0x8] sm:$0xff] }
  0x55   :  { %606 = vmatpush3.bf16.msra.mxu1 %v603_v9  ;;  %572 = vmatprep.subr.bf16.mxu0 %v571_v23  ;;  %v591_v48 = vpack.c.bf16 %v96_v47, %v95_v46  ;;  %v80_v49 = vld [vmem:[#allocation3 + $0x8] sm:$0xff]  ;;  %v627_v52 = vpack.c.bf16 %v282_v51, %v281_v50  ;;  %v283_v53 = vld [vmem:[#allocation9 + $0x10] sm:$0xff]  ;;  %v285_v56 = vld [vmem:[#allocation9 + $0x20] sm:$0xff] }
  0x56   :  { %608 = vmatprep.subr.bf16.mxu1 %v607_v20  ;;  %v284_v54 = vld [vmem:[#allocation9 + $0x18] sm:$0xff]  ;;  %v286_v57 = vld [vmem:[#allocation9 + $0x28] sm:$0xff]  ;;  %v287_v59 = vld [vmem:[#allocation9 + $0x30] sm:$0xff] }
  0x57   :  { %v631_v55 = vpack.c.bf16 %v284_v54, %v283_v53  ;;  %v635_v58 = vpack.c.bf16 %v286_v57, %v285_v56  ;;  %v288_v60 = vld [vmem:[#allocation9 + $0x38] sm:$0xff]  ;;  %v289_v62 = vld [vmem:[#allocation9 + $0x40] sm:$0xff]  ;;  %v290_v63 = vld [vmem:[#allocation9 + $0x48] sm:$0xff] }
  0x58   :  { %574 = vmatpush3.bf16.msra.mxu0 %v571_v23  ;;  %v639_v61 = vpack.c.bf16 %v288_v60, %v287_v59  ;;  %v643_v0 = vpack.c.bf16 %v290_v63, %v289_v62  ;;  %v291_v1 = vld [vmem:[#allocation9 + $0x50] sm:$0xff]  ;;  %v292_v2 = vld [vmem:[#allocation9 + $0x58] sm:$0xff]  ;;  %v293_v4 = vld [vmem:[#allocation9 + $0x60] sm:$0xff] }
  0x59   :  { %610 = vmatpush3.bf16.msra.mxu1 %v607_v20  ;;  %576 = vmatprep.subr.bf16.mxu0 %v575_v29  ;;  %v647_v3 = vpack.c.bf16 %v292_v2, %v291_v1  ;;  %v294_v5 = vld [vmem:[#allocation9 + $0x68] sm:$0xff]  ;;  %v295_v7 = vld [vmem:[#allocation9 + $0x70] sm:$0xff]  ;;  %v296_v8 = vld [vmem:[#allocation9 + $0x78] sm:$0xff] }
  0x5a   :  { %612 = vmatprep.subr.bf16.mxu1 %v611_v26  ;;  %v651_v6 = vpack.c.bf16 %v294_v5, %v293_v4  ;;  %v655_v9 = vpack.c.bf16 %v296_v8, %v295_v7 }
  0x5c   :  { %578 = vmatpush3.bf16.msra.mxu0 %v575_v29 }
  0x5d   :  { %614 = vmatpush3.bf16.msra.mxu1 %v611_v26  ;;  %580 = vmatprep.subr.bf16.mxu0 %v579_v35 }
  0x5e   :  { %616 = vmatprep.subr.bf16.mxu1 %v615_v32 }
  0x60   :  { %582 = vmatpush3.bf16.msra.mxu0 %v579_v35 }
  0x61   :  { %618 = vmatpush3.bf16.msra.mxu1 %v615_v32  ;;  %584 = vmatprep.subr.bf16.mxu0 %v583_v41 }
  0x62   :  { %620 = vmatprep.subr.bf16.mxu1 %v619_v38 }
  0x64   :  { %586 = vmatpush3.bf16.msra.mxu0 %v583_v41 }
  0x65   :  { %622 = vmatpush3.bf16.msra.mxu1 %v619_v38  ;;  %588 = vmatprep.subr.bf16.mxu0 %v587_v45 }
  0x66   :  { %624 = vmatprep.subr.bf16.mxu1 %v623_v44 }
  0x68   :  { %590 = vmatpush3.bf16.msra.mxu0 %v587_v45 }
  0x69   :  { %626 = vmatpush3.bf16.msra.mxu1 %v623_v44  ;;  %592 = vmatprep.subr.bf16.mxu0 %v591_v48 }
  0x6c   :  { %526 = vmatmul.mubr.f32.vlgmr.msra.gmra.mrb[0].mxu1 %v80_v49  ;;  %594 = vmatpush3.bf16.msra.mxu0 %v591_v48 }
  0x6d   :  { %628 = vmatprep.subr.bf16.mxu0 %v627_v52 }
  0x6f   :  { %491 = vmatmul.mubr.f32.vlgmr.msra.gmra.mrb[0].mxu0 %v80_v49 }
  0x70   :  { %630 = vmatpush3.bf16.msra.mxu0 %v627_v52 }
  0x71   :  { %632 = vmatprep.subr.bf16.mxu0 %v631_v55 }
  0x74   :  { %634 = vmatpush3.bf16.msra.mxu0 %v631_v55 }
  0x75   :  { %636 = vmatprep.subr.bf16.mxu0 %v635_v58 }
  0x78   :  { %638 = vmatpush3.bf16.msra.mxu0 %v635_v58 }
  0x79   :  { %640 = vmatprep.subr.bf16.mxu0 %v639_v61 }
  0x7c   :  { %642 = vmatpush3.bf16.msra.mxu0 %v639_v61 }
  0x7d   :  { %644 = vmatprep.subr.bf16.mxu0 %v643_v0 }
  0x80   :  { %646 = vmatpush3.bf16.msra.mxu0 %v643_v0 }
  0x81   :  { %648 = vmatprep.subr.bf16.mxu0 %v647_v3 }
  0x84   :  { %650 = vmatpush3.bf16.msra.mxu0 %v647_v3 }
  0x85   :  { %652 = vmatprep.subr.bf16.mxu0 %v651_v6 }
  0x88   :  { %654 = vmatpush3.bf16.msra.mxu0 %v651_v6 }
  0x89   :  { %656 = vmatprep.subr.bf16.mxu0 %v655_v9 }
  0x8c   :  { %658 = vmatpush3.bf16.msra.mxu0 %v655_v9 }
 0x13f   :  { %v527_v10 = vpop.f32.mrb[0].mxu1 }
 0x140   :  { %v403_v11 = vmul.f32 -1.442695, %v527_v10  ;;  %v254_v12 = vpop.f32.mrb[1].mxu1 }
 0x141   :  { %v402_v13 = vmul.f32 -1.442695, %v254_v12 }
 0x142   :  { %666 = vpow2.f32 %v403_v11  ;;  %v492_v14 = vpop.f32.mrb[0].mxu0 }
 0x143   :  { %668 = vpow2.f32 %v402_v13  ;;  %v163_v15 = vpop.f32.mrb[1].mxu0 }
 0x14c   :  { %v667_v16 = vpop.eup %666 }
 0x14d   :  { %v669_v17 = vpop.eup %668  ;;  %v270_v18 = vadd.f32 1.0, %v667_v16 }
 0x14e   :  { %v269_v19 = vadd.f32 1.0, %v669_v17 }
 0x14f   :  { %670 = vrcp.f32 %v270_v18 }
 0x150   :  { %672 = vrcp.f32 %v269_v19 }
 0x159   :  { %v671_v20 = vpop.eup %670 }
 0x15a   :  { %v673_v21 = vpop.eup %672  ;;  %v276_v22 = vmul.f32 %v671_v20, %v527_v10 }
 0x15b   :  { %v275_v23 = vmul.f32 %v673_v21, %v254_v12 }
 0x15c   :  { %v278_v24 = vmul.f32 %v492_v14, %v276_v22 }
 0x15d   :  { %v277_v25 = vmul.f32 %v275_v23, %v163_v15 }
 0x15f   :  { %560 = vmatprep.mubr.f32.mxu0 %v277_v25 }
 0x160   :  { %561 = vmatmul.mubr.f32.vlgmr.msra.gmra.mrb[2].mxu0 %v278_v24 }
 0x233   :  { %v562_v26 = vpop.f32.mrb[2].mxu0 }
 0x234   :  { %382 = vst [vmem:[#allocation11 + $0x8] sm:$0xff] %v562_v26  ;;  %v363_v27 = vpop.f32.mrb[3].mxu0 }
 0x235   :  { %381 = vst [vmem:[#allocation11] sm:$0xff] %v363_v27 }
 0x236   :  { %773 = shalt.err (!%p770_p8)
}
 0x237   :  { %s774_s15 = scalar_lea.hbm %s917_s4, 256 }
 0x238   :  { %p775_p9 = scmp.ne.s32.totalorder %s917_s4, %s774_s15  ;;  %p778_p10 = scmp.lt.u32.totalorder %s774_s15, %s917_s4 }
 0x23a   :  { %p780_p11 = pnand %p778_p10, %p775_p9 }
 0x23c   :  { %783 = shalt.err (!%p780_p11)
}
 0x23d   :  { %394 = dma.vmem_to_hbm [thread:$0]  %s389_s12, 256, %s917_s4, [#allocation5], %s794_s27, %s794_s27, %s795_s28  }
 0x23e   :  { %790 = dma.done.wait [#allocation5], 256  }
 0x23f   :  { %791 = vsyncadd [#allocation5], 4294967040 }
 0x240   :  { %398 = vsyncpa [#allocation4], 1 }
 0x241   :  { %399 = vsyncpa [#allocation7], 1 }
 0x242   :  { %400 = vsyncpa [#allocation10], 1 }
 0x243   :  { %401 = vsyncpa [#allocation5], 1 }

// kernel: tpu_custom_call.1
= control target key start
LH: loop header
LB: loop body
LE: loop exit
PB: predicated region body
PF: predicated region fallthrough
CT: control target
= control target key end

     0   :  { %9 = vsyncpa [#allocation4], 0  ;;  %s913_s0 = inlined_call_operand.hbm [shape: f32[16,128], index: 0, kind: input, shape index: {}]   ;;  %s914_s1 = inlined_call_operand.hbm [shape: f32[128,128], index: 1, kind: input, shape index: {}]   ;;  %s915_s2 = inlined_call_operand.hbm [shape: f32[128,128], index: 2, kind: input, shape index: {}]   ;;  %s916_s3 = inlined_call_operand.hbm [shape: f32[128,128], index: 3, kind: input, shape index: {}]   ;;  %s917_s4 = inlined_call_operand.hbm [shape: f32[16,128], index: 4, kind: output, shape index: {}]  }
   0x1   :  { %10 = vsyncpa [#allocation7], 0 }
   0x2   :  { %11 = vsyncpa [#allocation10], 0 }
   0x3   :  { %12 = vsyncpa [#allocation5], 0  ;;  %s792_s15 = smov [#allocation6]   ;;  %s793_s17 = smov [#allocation3]  }
   0x4   :  { %s30_s16 = sshll.u32 %s792_s15, 4  ;;  %s18_s18 = sshll.u32 %s793_s17, 4  ;;  %s31_s16 = int_to_ptr.vmem [resolvable:$true] %s30_s16  ;;  %s824_s18 = int_to_ptr.vmem [resolvable:$true] %s18_s18 }
   0x5   :  { %s674_s21 = scalar_lea.hbm %s914_s1, 2048 }
   0x6   :  { %p675_p0 = scmp.ne.s32.totalorder %s914_s1, %s674_s21  ;;  %p678_p1 = scmp.lt.u32.totalorder %s674_s21, %s914_s1 }
   0x8   :  { %p680_p2 = pnand %p678_p1, %p675_p0 }
   0xa   :  { %683 = shalt.err (!%p680_p2)
}
   0xb   :  { %s684_s26 = scalar_lea.vmem %s31_s16, 2048  ;;  %p689_p4 = scmp.lt.s32.totalorder %s31_s16, %s31_s16 }
   0xc   :  { %p685_p3 = scmp.ne.s32.totalorder %s31_s16, %s684_s26  ;;  %p690_p5 = scmp.lt.s32.totalorder %s684_s26, %s684_s26 }
   0xe   :  { %p691_p6 = por %p690_p5, %p689_p4 }
  0x10   :  { %p692_p7 = pnand %p691_p6, %p685_p3 }
  0x12   :  { %695 = shalt.err (!%p692_p7)
}
  0x13   :  { %s794_s27 = smov 128   ;;  %s795_s28 = smov 8  }
  0x14   :  { %36 = dma.hbm_to_vmem [thread:$0]  %s914_s1, 2048, %s31_s16, [#allocation7], %s794_s27, %s794_s27, %s795_s28  }
  0x15   :  { %s696_s7 = scalar_lea.hbm %s913_s0, 256 }
  0x16   :  { %p697_p8 = scmp.ne.s32.totalorder %s913_s0, %s696_s7  ;;  %p700_p9 = scmp.lt.u32.totalorder %s696_s7, %s913_s0 }
  0x18   :  { %p702_p10 = pnand %p700_p9, %p697_p8 }
  0x1a   :  { %705 = shalt.err (!%p702_p10)
}
  0x1b   :  { %s706_s12 = scalar_lea.vmem %s824_s18, 256  ;;  %p711_p12 = scmp.lt.s32.totalorder %s824_s18, %s824_s18 }
  0x1c   :  { %p707_p11 = scmp.ne.s32.totalorder %s824_s18, %s706_s12  ;;  %p712_p13 = scmp.lt.s32.totalorder %s706_s12, %s706_s12 }
  0x1e   :  { %p713_p0 = por %p712_p13, %p711_p12 }
  0x20   :  { %p714_p1 = pnand %p713_p0, %p707_p11 }
  0x22   :  { %717 = shalt.err (!%p714_p1)
}
  0x23   :  { %24 = dma.hbm_to_vmem [thread:$0]  %s913_s0, 256, %s824_s18, [#allocation4], %s794_s27, %s794_s27, %s795_s28  }
  0x24   :  { %s796_s14 = smov [#allocation8]   ;;  %s797_s16 = smov [#allocation9]  }
  0x25   :  { %s42_s15 = sshll.u32 %s796_s14, 4  ;;  %s54_s17 = sshll.u32 %s797_s16, 4  ;;  %s43_s15 = int_to_ptr.vmem [resolvable:$true] %s42_s15  ;;  %s861_s17 = int_to_ptr.vmem [resolvable:$true] %s54_s17 }
  0x26   :  { %s718_s21 = scalar_lea.hbm %s915_s2, 2048 }
  0x27   :  { %p719_p2 = scmp.ne.s32.totalorder %s915_s2, %s718_s21  ;;  %p722_p3 = scmp.lt.u32.totalorder %s718_s21, %s915_s2 }
  0x29   :  { %p724_p4 = pnand %p722_p3, %p719_p2 }
  0x2b   :  { %727 = shalt.err (!%p724_p4)
}
  0x2c   :  { %s728_s0 = scalar_lea.vmem %s43_s15, 2048  ;;  %p733_p6 = scmp.lt.s32.totalorder %s43_s15, %s43_s15 }
  0x2d   :  { %p729_p5 = scmp.ne.s32.totalorder %s43_s15, %s728_s0  ;;  %p734_p7 = scmp.lt.s32.totalorder %s728_s0, %s728_s0 }
  0x2f   :  { %p735_p8 = por %p734_p7, %p733_p6 }
  0x31   :  { %p736_p9 = pnand %p735_p8, %p729_p5 }
  0x33   :  { %739 = shalt.err (!%p736_p9)
}
  0x34   :  { %48 = dma.hbm_to_vmem [thread:$0]  %s915_s2, 2048, %s43_s15, [#allocation7], %s794_s27, %s794_s27, %s795_s28  }
  0x35   :  { %s740_s5 = scalar_lea.hbm %s916_s3, 2048 }
  0x36   :  { %p741_p10 = scmp.ne.s32.totalorder %s916_s3, %s740_s5  ;;  %p744_p11 = scmp.lt.u32.totalorder %s740_s5, %s916_s3 }
  0x38   :  { %p746_p12 = pnand %p744_p11, %p741_p10 }
  0x3a   :  { %749 = shalt.err (!%p746_p12)
}
  0x3b   :  { %s750_s10 = scalar_lea.vmem %s861_s17, 2048  ;;  %p755_p0 = scmp.lt.s32.totalorder %s861_s17, %s861_s17 }
  0x3c   :  { %p751_p13 = scmp.ne.s32.totalorder %s861_s17, %s750_s10  ;;  %p756_p1 = scmp.lt.s32.totalorder %s750_s10, %s750_s10 }
  0x3e   :  { %p757_p2 = por %p756_p1, %p755_p0 }
  0x40   :  { %p758_p3 = pnand %p757_p2, %p751_p13 }
  0x42   :  { %761 = shalt.err (!%p758_p3)
}
  0x43   :  { %60 = dma.hbm_to_vmem [thread:$0]  %s916_s3, 2048, %s861_s17, [#allocation10], %s794_s27, %s794_s27, %s795_s28  }
  0x44   :  { %784 = dma.done.wait [#allocation4], 256  }
  0x45   :  { %785 = vsyncadd [#allocation4], 4294967040 }
  0x46   :  { %786 = dma.done.wait [#allocation7], 4096  }
  0x47   :  { %787 = vsyncadd [#allocation7], 4294963200 }
  0x48   :  { %788 = dma.done.wait [#allocation10], 2048  }
  0x49   :  { %789 = vsyncadd [#allocation10], 4294965248  ;;  %v172_v0 = vld [vmem:[#allocation8] sm:$0xff]  ;;  %v173_v1 = vld [vmem:[#allocation8 + $0x8] sm:$0xff]  ;;  %s798_s3 = smov [#allocation11]  }
  0x4a   :  { %v174_v2 = vld [vmem:[#allocation8 + $0x10] sm:$0xff]  ;;  %v595_v3 = vpack.c.bf16 %v173_v1, %v172_v0  ;;  %v175_v4 = vld [vmem:[#allocation8 + $0x18] sm:$0xff]  ;;  %v176_v6 = vld [vmem:[#allocation8 + $0x20] sm:$0xff]  ;;  %s388_s12 = sshll.u32 %s798_s3, 4  ;;  %s389_s12 = int_to_ptr.vmem [resolvable:$true] %s388_s12 }
  0x4b   :  { %v599_v5 = vpack.c.bf16 %v175_v4, %v174_v2  ;;  %v177_v7 = vld [vmem:[#allocation8 + $0x28] sm:$0xff]  ;;  %v81_v8 = vld [vmem:[#allocation6] sm:$0xff]  ;;  %v178_v10 = vld [vmem:[#allocation8 + $0x30] sm:$0xff]  ;;  %s762_s1 = scalar_lea.vmem %s389_s12, 256  ;;  %p767_p5 = scmp.lt.s32.totalorder %s389_s12, %s389_s12 }
  0x4c   :  { %596 = vmatprep.subr.bf16.mxu1 %v595_v3  ;;  %v603_v9 = vpack.c.bf16 %v177_v7, %v176_v6  ;;  %v179_v11 = vld [vmem:[#allocation8 + $0x38] sm:$0xff]  ;;  %v82_v12 = vld [vmem:[#allocation6 + $0x8] sm:$0xff]  ;;  %v83_v14 = vld [vmem:[#allocation6 + $0x10] sm:$0xff]  ;;  %p763_p4 = scmp.ne.s32.totalorder %s389_s12, %s762_s1  ;;  %p768_p6 = scmp.lt.s32.totalorder %s762_s1, %s762_s1 }
  0x4d   :  { %598 = vmatpush3.bf16.msra.mxu1 %v595_v3  ;;  %v563_v13 = vpack.c.bf16 %v82_v12, %v81_v8  ;;  %v84_v15 = vld [vmem:[#allocation6 + $0x18] sm:$0xff]  ;;  %v79_v16 = vld [vmem:[#allocation3] sm:$0xff]  ;;  %v85_v18 = vld [vmem:[#allocation6 + $0x20] sm:$0xff]  ;;  %v607_v20 = vpack.c.bf16 %v179_v11, %v178_v10 }
  0x4e   :  { %600 = vmatprep.subr.bf16.mxu1 %v599_v5  ;;  %v567_v17 = vpack.c.bf16 %v84_v15, %v83_v14  ;;  %525 = vmatprep.mubr.f32.mxu1 %v79_v16  ;;  %v86_v19 = vld [vmem:[#allocation6 + $0x28] sm:$0xff]  ;;  %v180_v21 = vld [vmem:[#allocation8 + $0x40] sm:$0xff]  ;;  %v87_v24 = vld [vmem:[#allocation6 + $0x30] sm:$0xff]  ;;  %p769_p7 = por %p768_p6, %p767_p5 }
  0x4f   :  { %490 = vmatprep.mubr.f32.mxu0 %v79_v16  ;;  %564 = vmatprep.subr.bf16.mxu0 %v563_v13  ;;  %v181_v22 = vld [vmem:[#allocation8 + $0x48] sm:$0xff]  ;;  %v571_v23 = vpack.c.bf16 %v86_v19, %v85_v18  ;;  %v88_v25 = vld [vmem:[#allocation6 + $0x38] sm:$0xff]  ;;  %v182_v27 = vld [vmem:[#allocation8 + $0x50] sm:$0xff] }
  0x50   :  { %566 = vmatpush3.bf16.msra.mxu0 %v563_v13  ;;  %v611_v26 = vpack.c.bf16 %v181_v22, %v180_v21  ;;  %v183_v28 = vld [vmem:[#allocation8 + $0x58] sm:$0xff]  ;;  %v575_v29 = vpack.c.bf16 %v88_v25, %v87_v24  ;;  %v89_v30 = vld [vmem:[#allocation6 + $0x40] sm:$0xff]  ;;  %v90_v31 = vld [vmem:[#allocation6 + $0x48] sm:$0xff]  ;;  %p770_p8 = pnand %p769_p7, %p763_p4 }
  0x51   :  { %602 = vmatpush3.bf16.msra.mxu1 %v599_v5  ;;  %568 = vmatprep.subr.bf16.mxu0 %v567_v17  ;;  %v615_v32 = vpack.c.bf16 %v183_v28, %v182_v27  ;;  %v184_v33 = vld [vmem:[#allocation8 + $0x60] sm:$0xff]  ;;  %v185_v34 = vld [vmem:[#allocation8 + $0x68] sm:$0xff]  ;;  %v579_v35 = vpack.c.bf16 %v90_v31, %v89_v30  ;;  %v91_v36 = vld [vmem:[#allocation6 + $0x50] sm:$0xff] }
  0x52   :  { %604 = vmatprep.subr.bf16.mxu1 %v603_v9  ;;  %v92_v37 = vld [vmem:[#allocation6 + $0x58] sm:$0xff]  ;;  %v619_v38 = vpack.c.bf16 %v185_v34, %v184_v33  ;;  %v186_v39 = vld [vmem:[#allocation8 + $0x70] sm:$0xff]  ;;  %v93_v42 = vld [vmem:[#allocation6 + $0x60] sm:$0xff] }
  0x53   :  { %v187_v40 = vld [vmem:[#allocation8 + $0x78] sm:$0xff]  ;;  %v583_v41 = vpack.c.bf16 %v92_v37, %v91_v36  ;;  %v94_v43 = vld [vmem:[#allocation6 + $0x68] sm:$0xff]  ;;  %v95_v46 = vld [vmem:[#allocation6 + $0x70] sm:$0xff] }
  0x54   :  { %570 = vmatpush3.bf16.msra.mxu0 %v567_v17  ;;  %v623_v44 = vpack.c.bf16 %v187_v40, %v186_v39  ;;  %v587_v45 = vpack.c.bf16 %v94_v43, %v93_v42  ;;  %v96_v47 = vld [vmem:[#allocation6 + $0x78] sm:$0xff]  ;;  %v281_v50 = vld [vmem:[#allocation9] sm:$0xff]  ;;  %v282_v51 = vld [vmem:[#allocation9 + $0x8] sm:$0xff] }
  0x55   :  { %606 = vmatpush3.bf16.msra.mxu1 %v603_v9  ;;  %572 = vmatprep.subr.bf16.mxu0 %v571_v23  ;;  %v591_v48 = vpack.c.bf16 %v96_v47, %v95_v46  ;;  %v80_v49 = vld [vmem:[#allocation3 + $0x8] sm:$0xff]  ;;  %v627_v52 = vpack.c.bf16 %v282_v51, %v281_v50  ;;  %v283_v53 = vld [vmem:[#allocation9 + $0x10] sm:$0xff]  ;;  %v285_v56 = vld [vmem:[#allocation9 + $0x20] sm:$0xff] }
  0x56   :  { %608 = vmatprep.subr.bf16.mxu1 %v607_v20  ;;  %v284_v54 = vld [vmem:[#allocation9 + $0x18] sm:$0xff]  ;;  %v286_v57 = vld [vmem:[#allocation9 + $0x28] sm:$0xff]  ;;  %v287_v59 = vld [vmem:[#allocation9 + $0x30] sm:$0xff] }
  0x57   :  { %v631_v55 = vpack.c.bf16 %v284_v54, %v283_v53  ;;  %v635_v58 = vpack.c.bf16 %v286_v57, %v285_v56  ;;  %v288_v60 = vld [vmem:[#allocation9 + $0x38] sm:$0xff]  ;;  %v289_v62 = vld [vmem:[#allocation9 + $0x40] sm:$0xff]  ;;  %v290_v63 = vld [vmem:[#allocation9 + $0x48] sm:$0xff] }
  0x58   :  { %574 = vmatpush3.bf16.msra.mxu0 %v571_v23  ;;  %v639_v61 = vpack.c.bf16 %v288_v60, %v287_v59  ;;  %v643_v0 = vpack.c.bf16 %v290_v63, %v289_v62  ;;  %v291_v1 = vld [vmem:[#allocation9 + $0x50] sm:$0xff]  ;;  %v292_v2 = vld [vmem:[#allocation9 + $0x58] sm:$0xff]  ;;  %v293_v4 = vld [vmem:[#allocation9 + $0x60] sm:$0xff] }
  0x59   :  { %610 = vmatpush3.bf16.msra.mxu1 %v607_v20  ;;  %576 = vmatprep.subr.bf16.mxu0 %v575_v29  ;;  %v647_v3 = vpack.c.bf16 %v292_v2, %v291_v1  ;;  %v294_v5 = vld [vmem:[#allocation9 + $0x68] sm:$0xff]  ;;  %v295_v7 = vld [vmem:[#allocation9 + $0x70] sm:$0xff]  ;;  %v296_v8 = vld [vmem:[#allocation9 + $0x78] sm:$0xff] }
  0x5a   :  { %612 = vmatprep.subr.bf16.mxu1 %v611_v26  ;;  %v651_v6 = vpack.c.bf16 %v294_v5, %v293_v4  ;;  %v655_v9 = vpack.c.bf16 %v296_v8, %v295_v7 }
  0x5c   :  { %578 = vmatpush3.bf16.msra.mxu0 %v575_v29 }
  0x5d   :  { %614 = vmatpush3.bf16.msra.mxu1 %v611_v26  ;;  %580 = vmatprep.subr.bf16.mxu0 %v579_v35 }
  0x5e   :  { %616 = vmatprep.subr.bf16.mxu1 %v615_v32 }
  0x60   :  { %582 = vmatpush3.bf16.msra.mxu0 %v579_v35 }
  0x61   :  { %618 = vmatpush3.bf16.msra.mxu1 %v615_v32  ;;  %584 = vmatprep.subr.bf16.mxu0 %v583_v41 }
  0x62   :  { %620 = vmatprep.subr.bf16.mxu1 %v619_v38 }
  0x64   :  { %586 = vmatpush3.bf16.msra.mxu0 %v583_v41 }
  0x65   :  { %622 = vmatpush3.bf16.msra.mxu1 %v619_v38  ;;  %588 = vmatprep.subr.bf16.mxu0 %v587_v45 }
  0x66   :  { %624 = vmatprep.subr.bf16.mxu1 %v623_v44 }
  0x68   :  { %590 = vmatpush3.bf16.msra.mxu0 %v587_v45 }
  0x69   :  { %626 = vmatpush3.bf16.msra.mxu1 %v623_v44  ;;  %592 = vmatprep.subr.bf16.mxu0 %v591_v48 }
  0x6c   :  { %526 = vmatmul.mubr.f32.vlgmr.msra.gmra.mrb[0].mxu1 %v80_v49  ;;  %594 = vmatpush3.bf16.msra.mxu0 %v591_v48 }
  0x6d   :  { %628 = vmatprep.subr.bf16.mxu0 %v627_v52 }
  0x6f   :  { %491 = vmatmul.mubr.f32.vlgmr.msra.gmra.mrb[0].mxu0 %v80_v49 }
  0x70   :  { %630 = vmatpush3.bf16.msra.mxu0 %v627_v52 }
  0x71   :  { %632 = vmatprep.subr.bf16.mxu0 %v631_v55 }
  0x74   :  { %634 = vmatpush3.bf16.msra.mxu0 %v631_v55 }
  0x75   :  { %636 = vmatprep.subr.bf16.mxu0 %v635_v58 }
  0x78   :  { %638 = vmatpush3.bf16.msra.mxu0 %v635_v58 }
  0x79   :  { %640 = vmatprep.subr.bf16.mxu0 %v639_v61 }
  0x7c   :  { %642 = vmatpush3.bf16.msra.mxu0 %v639_v61 }
  0x7d   :  { %644 = vmatprep.subr.bf16.mxu0 %v643_v0 }
  0x80   :  { %646 = vmatpush3.bf16.msra.mxu0 %v643_v0 }
  0x81   :  { %648 = vmatprep.subr.bf16.mxu0 %v647_v3 }
  0x84   :  { %650 = vmatpush3.bf16.msra.mxu0 %v647_v3 }
  0x85   :  { %652 = vmatprep.subr.bf16.mxu0 %v651_v6 }
  0x88   :  { %654 = vmatpush3.bf16.msra.mxu0 %v651_v6 }
  0x89   :  { %656 = vmatprep.subr.bf16.mxu0 %v655_v9 }
  0x8c   :  { %658 = vmatpush3.bf16.msra.mxu0 %v655_v9 }
 0x13f   :  { %v527_v10 = vpop.f32.mrb[0].mxu1 }
 0x140   :  { %v403_v11 = vmul.f32 -1.442695, %v527_v10  ;;  %v254_v12 = vpop.f32.mrb[1].mxu1 }
 0x141   :  { %v402_v13 = vmul.f32 -1.442695, %v254_v12 }
 0x142   :  { %666 = vpow2.f32 %v403_v11  ;;  %v492_v14 = vpop.f32.mrb[0].mxu0 }
 0x143   :  { %668 = vpow2.f32 %v402_v13  ;;  %v163_v15 = vpop.f32.mrb[1].mxu0 }
 0x14c   :  { %v667_v16 = vpop.eup %666 }
 0x14d   :  { %v669_v17 = vpop.eup %668  ;;  %v270_v18 = vadd.f32 1.0, %v667_v16 }
 0x14e   :  { %v269_v19 = vadd.f32 1.0, %v669_v17 }
 0x14f   :  { %670 = vrcp.f32 %v270_v18 }
 0x150   :  { %672 = vrcp.f32 %v269_v19 }
 0x159   :  { %v671_v20 = vpop.eup %670 }
 0x15a   :  { %v673_v21 = vpop.eup %672  ;;  %v276_v22 = vmul.f32 %v671_v20, %v527_v10 }
 0x15b   :  { %v275_v23 = vmul.f32 %v673_v21, %v254_v12 }
 0x15c   :  { %v278_v24 = vmul.f32 %v492_v14, %v276_v22 }
 0x15d   :  { %v277_v25 = vmul.f32 %v275_v23, %v163_v15 }
 0x15f   :  { %560 = vmatprep.mubr.f32.mxu0 %v277_v25 }
 0x160   :  { %561 = vmatmul.mubr.f32.vlgmr.msra.gmra.mrb[2].mxu0 %v278_v24 }
 0x233   :  { %v562_v26 = vpop.f32.mrb[2].mxu0 }
 0x234   :  { %382 = vst [vmem:[#allocation11 + $0x8] sm:$0xff] %v562_v26  ;;  %v363_v27 = vpop.f32.mrb[3].mxu0 }
 0x235   :  { %381 = vst [vmem:[#allocation11] sm:$0xff] %v363_v27 }
 0x236   :  { %773 = shalt.err (!%p770_p8)
}
 0x237   :  { %s774_s15 = scalar_lea.hbm %s917_s4, 256 }
 0x238   :  { %p775_p9 = scmp.ne.s32.totalorder %s917_s4, %s774_s15  ;;  %p778_p10 = scmp.lt.u32.totalorder %s774_s15, %s917_s4 }
 0x23a   :  { %p780_p11 = pnand %p778_p10, %p775_p9 }
 0x23c   :  { %783 = shalt.err (!%p780_p11)
}
 0x23d   :  { %394 = dma.vmem_to_hbm [thread:$0]  %s389_s12, 256, %s917_s4, [#allocation5], %s794_s27, %s794_s27, %s795_s28  }
 0x23e   :  { %790 = dma.done.wait [#allocation5], 256  }
 0x23f   :  { %791 = vsyncadd [#allocation5], 4294967040 }
 0x240   :  { %398 = vsyncpa [#allocation4], 1 }
 0x241   :  { %399 = vsyncpa [#allocation7], 1 }
 0x242   :  { %400 = vsyncpa [#allocation10], 1 }
 0x243   :  { %401 = vsyncpa [#allocation5], 1 }

</bundles_post_ra>
